<compile_context>
chip_gen: v6e
topology: v6e:2x2x1
jax: 0.10.0
libtpu: 0.0.40
codegen_flags: <defaults>
</compile_context>

<pallas_src>
import functools
import math

import jax
import jax.numpy as jnp
from jax import lax
from jax.experimental import pallas as pl
from jax.experimental.pallas import tpu as pltpu

OBS_PAD = 32    # padded observation width (bf16, 16-sublane friendly, 25 -> 32)
HEAD_PAD = 8    # fused actor(4) + critic(1) + pad(3) output columns


def _round_up(n, m):
    return ((n + m - 1) // m) * m


def _actor_critic_kernel(action_dim,
                         x_ref,      # (TB, OBS_PAD)   bf16
                         w1_ref,     # (OBS_PAD, H)    bf16
                         b1_ref,     # (1, H)          f32
                         w2_ref,     # (H, H)          bf16
                         b2_ref,     # (1, H)          f32
                         wh_ref,     # (H, HEAD_PAD)   bf16  (fused heads)
                         bh_ref,     # (1, HEAD_PAD)   f32
                         out_ref):   # (TB, HEAD_PAD)  f32
    # Shared MLP: bf16 MXU matmuls with f32 accumulation, VPU ReLU.
    h1 = jnp.dot(x_ref[...], w1_ref[...],
                 preferred_element_type=jnp.float32) + b1_ref[...]
    h1 = jnp.maximum(h1, 0.0)
    h2 = jnp.dot(h1.astype(jnp.bfloat16), w2_ref[...],
                 preferred_element_type=jnp.float32) + b2_ref[...]
    h2 = jnp.maximum(h2, 0.0)

    # Fused actor/critic heads: one MXU pass, one narrow f32 store.
    heads = jnp.dot(h2.astype(jnp.bfloat16), wh_ref[...],
                    preferred_element_type=jnp.float32) + bh_ref[...]
    col = lax.broadcasted_iota(jnp.int32, heads.shape, 1)
    # tanh only on actor columns; critic (and pad) columns stay linear.
    out_ref[...] = jnp.where(col < action_dim, jnp.tanh(heads), heads)


def prepare_params(params):
    """One-time packing: pad obs dim, fuse heads, cast weights to bf16,
    precompute action_std row."""
    obs_dim, hidden = params["w1"].shape
    action_dim = params["wm"].shape[1]
    assert obs_dim <= OBS_PAD and action_dim + 1 <= HEAD_PAD

    w1 = jnp.zeros((OBS_PAD, hidden), jnp.float32).at[:obs_dim, :].set(params["w1"])
    wh = (jnp.zeros((hidden, HEAD_PAD), jnp.float32)
          .at[:, :action_dim].set(params["wm"])
          .at[:, action_dim:action_dim + 1].set(params["wv"]))
    bh = (jnp.zeros((1, HEAD_PAD), jnp.float32)
          .at[:, :action_dim].set(params["bm"])
          .at[:, action_dim:action_dim + 1].set(params["bv"]))

    return {
        "w1": w1.astype(jnp.bfloat16),
        "b1": params["b1"].astype(jnp.float32),
        "w2": params["w2"].astype(jnp.bfloat16),
        "b2": params["b2"].astype(jnp.float32),
        "wh": wh.astype(jnp.bfloat16),
        "bh": bh,
        "std": jnp.exp(params["logstd"]).astype(jnp.float32),  # (1, action_dim)
        "action_dim": action_dim,
    }


def _choose_batch_tile(B):
    """Largest useful tile (multiple of 16), but keep >=2 grid steps when the
    batch is big enough so the 'parallel' axis spans both v7x TensorCores."""
    tb = min(1024, _round_up(B, 16))
    half = _round_up((B + 1) // 2, 16)
    if 16 <= half < tb:
        tb = half
    return tb


@functools.partial(jax.jit, static_argnames=())
def actor_critic_forward(x, prep):
    B, obs_dim = x.shape
    hidden = prep["w2"].shape[0]
    action_dim = prep["std"].shape[1]

    tb = _choose_batch_tile(B)
    b_pad = _round_up(B, tb)

    # Lane/sublane-aligned bf16 x slab (fused into this jit; no in-kernel cast).
    x_pad = (jnp.zeros((b_pad, OBS_PAD), jnp.bfloat16)
             .at[:B, :obs_dim].set(x.astype(jnp.bfloat16)))

    kernel = functools.partial(_actor_critic_kernel, action_dim)

    heads = pl.pallas_call(
        kernel,
        out_shape=jax.ShapeDtypeStruct((b_pad, HEAD_PAD), jnp.float32),
        grid=(b_pad // tb,),
        in_specs=[
            pl.BlockSpec((tb, OBS_PAD), lambda i: (i, 0)),        # x tile
            pl.BlockSpec((OBS_PAD, hidden), lambda i: (0, 0)),    # w1 (resident)
            pl.BlockSpec((1, hidden), lambda i: (0, 0)),          # b1
            pl.BlockSpec((hidden, hidden), lambda i: (0, 0)),     # w2 (resident)
            pl.BlockSpec((1, hidden), lambda i: (0, 0)),          # b2
            pl.BlockSpec((hidden, HEAD_PAD), lambda i: (0, 0)),   # fused head W
            pl.BlockSpec((1, HEAD_PAD), lambda i: (0, 0)),        # fused head b
        ],
        out_specs=pl.BlockSpec((tb, HEAD_PAD), lambda i: (i, 0)),
        compiler_params=pltpu.CompilerParams(
            dimension_semantics=("parallel",)),
    )(x_pad, prep["w1"], prep["b1"], prep["w2"], prep["b2"],
      prep["wh"], prep["bh"])

    mean = heads[:B, :action_dim]
    value = heads[:B, action_dim:action_dim + 1]
    std = jnp.broadcast_to(prep["std"], (B, action_dim))
    return mean, std, value


def _orthogonal(key, shape, gain):
    """Deterministic orthogonal init (torch.nn.init.orthogonal_ semantics)."""
    rows, cols = shape
    n = max(rows, cols)
    a = jax.random.normal(key, (n, n), dtype=jnp.float32)
    q, r = jnp.linalg.qr(a)
    q = q * jnp.sign(jnp.diag(r))
    return gain * q[:rows, :cols].astype(jnp.float32)


def init_params(key, obs_dim=25, action_dim=4, hidden_size=256):
    gain = math.sqrt(2.0)
    k1, k2, k3, k4 = jax.random.split(key, 4)
    return {
        # weights stored (in, out)  (== PyTorch W.T)
        "w1": _orthogonal(k1, (obs_dim, hidden_size), gain),
        "b1": jnp.zeros((1, hidden_size), jnp.float32),
        "w2": _orthogonal(k2, (hidden_size, hidden_size), gain),
        "b2": jnp.zeros((1, hidden_size), jnp.float32),
        "wm": _orthogonal(k3, (hidden_size, action_dim), gain),
        "bm": jnp.zeros((1, action_dim), jnp.float32),
        "logstd": jnp.zeros((1, action_dim), jnp.float32),
        "wv": _orthogonal(k4, (hidden_size, 1), gain),
        "bv": jnp.zeros((1, 1), jnp.float32),
    }


def _reference_forward(x, params):
    """Pure-JAX reference mirroring the kernel's bf16-weight / f32-acc numerics."""
    def bdot(a, w):
        return jnp.dot(a.astype(jnp.bfloat16), w.astype(jnp.bfloat16),
                       preferred_element_type=jnp.float32)
    h = jnp.maximum(bdot(x, params["w1"]) + params["b1"], 0.0)
    h = jnp.maximum(bdot(h, params["w2"]) + params["b2"], 0.0)
    mean = jnp.tanh(bdot(h, params["wm"]) + params["bm"])
    std = jnp.broadcast_to(jnp.exp(params["logstd"]), mean.shape)
    value = bdot(h, params["wv"]) + params["bv"]
    return mean, std, value


if __name__ == "__main__":
    key = jax.random.PRNGKey(0)
    k_param, k_x_small, k_x_big = jax.random.split(key, 3)

    OBS_DIM, ACTION_DIM, HIDDEN = 25, 4, 256
    params = init_params(k_param, OBS_DIM, ACTION_DIM, HIDDEN)
    prep = prepare_params(params)

    ok = True
    # Small-batch (inference-like) and multi-tile (rollout-like) paths.
    for B, kx in ((8, k_x_small), (96, k_x_big)):
        x = jax.random.normal(kx, (B, OBS_DIM), dtype=jnp.float32)
        mean, std, value = actor_critic_forward(x, prep)
        jax.block_until_ready((mean, std, value))

        ref_mean, ref_std, ref_value = _reference_forward(x, params)
        ok &= mean.shape == (B, ACTION_DIM)
        ok &= std.shape == (B, ACTION_DIM)
        ok &= value.shape == (B, 1)
        ok &= bool(jnp.allclose(mean, ref_mean, atol=5e-3, rtol=5e-3))
        ok &= bool(jnp.allclose(std, ref_std, atol=1e-6, rtol=1e-6))
        ok &= bool(jnp.allclose(value, ref_value, atol=5e-3, rtol=5e-3))

    assert ok
    print("KERNEL_OK")
</pallas_src>

<mosaic_0001>
module attributes {stable_mosaic.version = 11 : i64} {
  func.func @_actor_critic_kernel(%arg0: i32, %arg1: memref<16x32xbf16, #tpu.memory_space<vmem>>, %arg2: memref<32x256xbf16, #tpu.memory_space<vmem>>, %arg3: memref<1x256xf32, #tpu.memory_space<vmem>>, %arg4: memref<256x256xbf16, #tpu.memory_space<vmem>>, %arg5: memref<1x256xf32, #tpu.memory_space<vmem>>, %arg6: memref<256x8xbf16, #tpu.memory_space<vmem>>, %arg7: memref<1x8xf32, #tpu.memory_space<vmem>>, %arg8: memref<16x8xf32, #tpu.memory_space<vmem>>) attributes {dimension_semantics = [#tpu.dimension_semantics<parallel>], iteration_bounds = array<i64: 1>, scalar_prefetch = 0 : i64, scratch_operands = 0 : i64, tpu.core_type = #tpu.core_type<tc>, window_params = [{transform_indices = @transform_0, window_bounds = array<i64: 16, 32>}, {pipeline_mode = #tpu.pipeline_mode<synchronous>, transform_indices = @transform_1, window_bounds = array<i64: 32, 256>}, {pipeline_mode = #tpu.pipeline_mode<synchronous>, transform_indices = @transform_2, window_bounds = array<i64: 1, 256>}, {pipeline_mode = #tpu.pipeline_mode<synchronous>, transform_indices = @transform_3, window_bounds = array<i64: 256, 256>}, {pipeline_mode = #tpu.pipeline_mode<synchronous>, transform_indices = @transform_4, window_bounds = array<i64: 1, 256>}, {pipeline_mode = #tpu.pipeline_mode<synchronous>, transform_indices = @transform_5, window_bounds = array<i64: 256, 8>}, {pipeline_mode = #tpu.pipeline_mode<synchronous>, transform_indices = @transform_6, window_bounds = array<i64: 1, 8>}, {transform_indices = @transform_7, window_bounds = array<i64: 16, 8>}]} {
    %c0 = arith.constant 0 : index
    %c0_0 = arith.constant 0 : index
    %0 = vector.load %arg1[%c0, %c0_0] : memref<16x32xbf16, #tpu.memory_space<vmem>>, vector<16x32xbf16>
    %c0_1 = arith.constant 0 : index
    %c0_2 = arith.constant 0 : index
    %1 = vector.load %arg2[%c0_1, %c0_2] : memref<32x256xbf16, #tpu.memory_space<vmem>>, vector<32x256xbf16>
    %cst = arith.constant dense<0.000000e+00> : vector<16x256xf32>
    %2 = tpu.matmul %0, %1, %cst {dimension_numbers = #tpu.dot_dimension_numbers<[1], [0], [0], [1], [0, 0, 1, 1], [], []>} : vector<16x32xbf16>, vector<32x256xbf16>, vector<16x256xf32> -> vector<16x256xf32>
    %c0_3 = arith.constant 0 : index
    %c0_4 = arith.constant 0 : index
    %3 = vector.load %arg3[%c0_3, %c0_4] : memref<1x256xf32, #tpu.memory_space<vmem>>, vector<1x256xf32>
    %4 = vector.broadcast %3 : vector<1x256xf32> to vector<16x256xf32>
    %5 = arith.addf %2, %4 : vector<16x256xf32>
    %cst_5 = arith.constant 0.000000e+00 : f32
    %6 = vector.broadcast %cst_5 : f32 to vector<16x256xf32>
    %7 = arith.maximumf %5, %6 : vector<16x256xf32>
    %8 = arith.truncf %7 : vector<16x256xf32> to vector<16x256xbf16>
    %c0_6 = arith.constant 0 : index
    %c0_7 = arith.constant 0 : index
    %9 = vector.load %arg4[%c0_6, %c0_7] : memref<256x256xbf16, #tpu.memory_space<vmem>>, vector<256x256xbf16>
    %cst_8 = arith.constant dense<0.000000e+00> : vector<16x256xf32>
    %10 = tpu.matmul %8, %9, %cst_8 {dimension_numbers = #tpu.dot_dimension_numbers<[1], [0], [0], [1], [0, 0, 1, 1], [], []>} : vector<16x256xbf16>, vector<256x256xbf16>, vector<16x256xf32> -> vector<16x256xf32>
    %c0_9 = arith.constant 0 : index
    %c0_10 = arith.constant 0 : index
    %11 = vector.load %arg5[%c0_9, %c0_10] : memref<1x256xf32, #tpu.memory_space<vmem>>, vector<1x256xf32>
    %12 = vector.broadcast %11 : vector<1x256xf32> to vector<16x256xf32>
    %13 = arith.addf %10, %12 : vector<16x256xf32>
    %cst_11 = arith.constant 0.000000e+00 : f32
    %14 = vector.broadcast %cst_11 : f32 to vector<16x256xf32>
    %15 = arith.maximumf %13, %14 : vector<16x256xf32>
    %16 = arith.truncf %15 : vector<16x256xf32> to vector<16x256xbf16>
    %c0_12 = arith.constant 0 : index
    %c0_13 = arith.constant 0 : index
    %17 = vector.load %arg6[%c0_12, %c0_13] : memref<256x8xbf16, #tpu.memory_space<vmem>>, vector<256x8xbf16>
    %cst_14 = arith.constant dense<0.000000e+00> : vector<16x8xf32>
    %18 = tpu.matmul %16, %17, %cst_14 {dimension_numbers = #tpu.dot_dimension_numbers<[1], [0], [0], [1], [0, 0, 1, 1], [], []>} : vector<16x256xbf16>, vector<256x8xbf16>, vector<16x8xf32> -> vector<16x8xf32>
    %c0_15 = arith.constant 0 : index
    %c0_16 = arith.constant 0 : index
    %19 = vector.load %arg7[%c0_15, %c0_16] : memref<1x8xf32, #tpu.memory_space<vmem>>, vector<1x8xf32>
    %20 = vector.broadcast %19 : vector<1x8xf32> to vector<16x8xf32>
    %21 = arith.addf %18, %20 : vector<16x8xf32>
    %22 = tpu.iota {dimensions = array<i32: 1>} : vector<16x8xi32>
    %c4_i32 = arith.constant 4 : i32
    %23 = vector.broadcast %c4_i32 : i32 to vector<16x8xi32>
    %24 = arith.cmpi slt, %22, %23 : vector<16x8xi32>
    %25 = math.tanh %21 : vector<16x8xf32>
    %26 = arith.select %24, %25, %21 : vector<16x8xi1>, vector<16x8xf32>
    %c0_17 = arith.constant 0 : index
    %c0_18 = arith.constant 0 : index
    %27 = vector.load %arg8[%c0_17, %c0_18] : memref<16x8xf32, #tpu.memory_space<vmem>>, vector<16x8xf32>
    tpu.vector_store %arg8[%c0_17, %c0_18], %26 {strides = array<i32>} : memref<16x8xf32, #tpu.memory_space<vmem>>, vector<16x8xf32>,
    return
  }
  func.func @transform_0(%arg0: i32) -> (i32, i32) {
    %c0_i32 = arith.constant 0 : i32
    %c0_i32_0 = arith.constant 0 : i32
    return %arg0, %c0_i32 : i32, i32
  }
  func.func @transform_1(%arg0: i32) -> (i32, i32) {
    %c0_i32 = arith.constant 0 : i32
    %c0_i32_0 = arith.constant 0 : i32
    %c0_i32_1 = arith.constant 0 : i32
    return %c0_i32, %c0_i32_0 : i32, i32
  }
  func.func @transform_2(%arg0: i32) -> (i32, i32) {
    %c0_i32 = arith.constant 0 : i32
    %c0_i32_0 = arith.constant 0 : i32
    %c0_i32_1 = arith.constant 0 : i32
    return %c0_i32, %c0_i32_0 : i32, i32
  }
  func.func @transform_3(%arg0: i32) -> (i32, i32) {
    %c0_i32 = arith.constant 0 : i32
    %c0_i32_0 = arith.constant 0 : i32
    %c0_i32_1 = arith.constant 0 : i32
    return %c0_i32, %c0_i32_0 : i32, i32
  }
  func.func @transform_4(%arg0: i32) -> (i32, i32) {
    %c0_i32 = arith.constant 0 : i32
    %c0_i32_0 = arith.constant 0 : i32
    %c0_i32_1 = arith.constant 0 : i32
    return %c0_i32, %c0_i32_0 : i32, i32
  }
  func.func @transform_5(%arg0: i32) -> (i32, i32) {
    %c0_i32 = arith.constant 0 : i32
    %c0_i32_0 = arith.constant 0 : i32
    %c0_i32_1 = arith.constant 0 : i32
    return %c0_i32, %c0_i32_0 : i32, i32
  }
  func.func @transform_6(%arg0: i32) -> (i32, i32) {
    %c0_i32 = arith.constant 0 : i32
    %c0_i32_0 = arith.constant 0 : i32
    %c0_i32_1 = arith.constant 0 : i32
    return %c0_i32, %c0_i32_0 : i32, i32
  }
  func.func @transform_7(%arg0: i32) -> (i32, i32) {
    %c0_i32 = arith.constant 0 : i32
    %c0_i32_0 = arith.constant 0 : i32
    return %arg0, %c0_i32 : i32, i32
  }
}

</mosaic_0001>

<bundles_post_ra>
// kernel: actor_critic_forward.1
= control target key start
LH: loop header
LB: loop body
LE: loop exit
PB: predicated region body
PF: predicated region fallthrough
CT: control target
= control target key end

     0   :  { %12 = vsyncpa [#allocation3], 0  ;;  %s759_s24 = smov [#allocation2]   ;;  %s886_s0 = inlined_call_operand.vmem [shape: bf16[16,32], index: 0, kind: input, shape index: {}]   ;;  %s887_s1 = inlined_call_operand.vmem [shape: bf16[32,256], index: 1, kind: input, shape index: {}]   ;;  %s888_s2 = inlined_call_operand.vmem [shape: f32[1,256], index: 2, kind: input, shape index: {}]   ;;  %s889_s3 = inlined_call_operand.hbm [shape: bf16[256,256], index: 3, kind: input, shape index: {}]   ;;  %s890_s4 = inlined_call_operand.vmem [shape: f32[1,256], index: 4, kind: input, shape index: {}]   ;;  %s891_s5 = inlined_call_operand.vmem [shape: bf16[256,8], index: 5, kind: input, shape index: {}]   ;;  %s892_s6 = inlined_call_operand.vmem [shape: f32[1,8], index: 6, kind: input, shape index: {}]   ;;  %s893_s7 = inlined_call_operand.vmem [shape: f32[16,8], index: 7, kind: output, shape index: {}]  }
   0x1   :  { %s24_s25 = sshll.u32 %s759_s24, 4  ;;  %s25_s25 = int_to_ptr.vmem [resolvable:$true] %s24_s25 }
   0x2   :  { %s745_s26 = scalar_lea.vmem %s25_s25, 4096  ;;  %p750_p1 = scmp.lt.s32.totalorder %s25_s25, %s25_s25 }
   0x3   :  { %p746_p0 = scmp.ne.s32.totalorder %s25_s25, %s745_s26  ;;  %p751_p2 = scmp.lt.s32.totalorder %s745_s26, %s745_s26 }
   0x5   :  { %p752_p3 = por %p751_p2, %p750_p1 }
   0x7   :  { %p753_p4 = pnand %p752_p3, %p746_p0 }
   0x9   :  { %756 = shalt.err (!%p753_p4)
}
   0xa   :  { %s760_s27 = smov 128   ;;  %s761_s28 = smov 8  }
   0xb   :  { %30 = dma.hbm_to_vmem [thread:$0]  %s889_s3, 4096, %s25_s25, [#allocation3], %s760_s27, %s760_s27, %s761_s28  }
   0xc   :  { %757 = dma.done.wait [#allocation3], 4096  }
   0xd   :  { %758 = vsyncadd [#allocation3], 4294963200  ;;  %v762_v0 = vmov 0   ;;  %v662_v1 = vld [vmem:[%s887_s1 + $0x14] ss:$8 sps:$4 sm:$0xff]   ;;  %v668_v8 = vld [vmem:[%s886_s0] sm:$0xff]   ;;  %v49_v48 = vlaneseq }
   0xe   :  { %120 = vmatprep.mubr.bf16.mxu0 %v762_v0  ;;  %v664_v2 = vld [vmem:[%s887_s1 + $0x10] ss:$8 sps:$4 sm:$0xff]   ;;  %100 = vmatprep.subr.bf16.mxu0 %v662_v1  ;;  %v665_v3 = vld [vmem:[%s887_s1 + $0x4] ss:$8 sps:$4 sm:$0xff]   ;;  %v667_v4 = vld [vmem:[%s887_s1] ss:$8 sps:$4 sm:$0xff]  }
   0xf   :  { %101 = vmatpush1.bf16.msra.mxu0 %v664_v2  ;;  %v669_v5 = vld [vmem:[#allocation2 + $0x74] ss:$8 sps:$4 sm:$0xff]   ;;  %v671_v6 = vld [vmem:[#allocation2 + $0x70] ss:$8 sps:$4 sm:$0xff]   ;;  %v672_v7 = vld [vmem:[#allocation2 + $0x64] ss:$8 sps:$4 sm:$0xff]  }
  0x10   :  { %102 = vmatprep.subr.bf16.mxu0 %v665_v3  ;;  %341 = vmatprep.subr.bf16.mxu1 %v669_v5  ;;  %vm84_vm0 = vcmask 261120   ;;  %v674_v9 = vld [vmem:[#allocation2 + $0x60] ss:$8 sps:$4 sm:$0xff]   ;;  %v675_v10 = vld [vmem:[#allocation2 + $0x54] ss:$8 sps:$4 sm:$0xff]   ;;  %v50_v49 = vshrl.u32 %v49_v48, 7 }
  0x11   :  { %342 = vmatpush1.bf16.msra.mxu1 %v671_v6  ;;  %v677_v11 = vld [vmem:[#allocation2 + $0x50] ss:$8 sps:$4 sm:$0xff]   ;;  %v678_v12 = vld [vmem:[#allocation2 + $0x44] ss:$8 sps:$4 sm:$0xff]   ;;  %v680_v13 = vld [vmem:[#allocation2 + $0x40] ss:$8 sps:$4 sm:$0xff]  }
  0x12   :  { %343 = vmatprep.subr.bf16.mxu1 %v672_v7  ;;  %v681_v14 = vld [vmem:[#allocation2 + $0x34] ss:$8 sps:$4 sm:$0xff]   ;;  %v683_v15 = vld [vmem:[#allocation2 + $0x30] ss:$8 sps:$4 sm:$0xff]   ;;  %v684_v16 = vld [vmem:[#allocation2 + $0x24] ss:$8 sps:$4 sm:$0xff]  }
  0x13   :  { %103 = vmatpush1.bf16.msra.mxu0 %v667_v4  ;;  %v686_v17 = vld [vmem:[#allocation2 + $0x20] ss:$8 sps:$4 sm:$0xff]   ;;  %v687_v18 = vld [vmem:[#allocation2 + $0x14] ss:$8 sps:$4 sm:$0xff]   ;;  %v689_v19 = vld [vmem:[#allocation2 + $0x10] ss:$8 sps:$4 sm:$0xff]  }
  0x14   :  { %v690_v20 = vld [vmem:[#allocation2 + $0x4] ss:$8 sps:$4 sm:$0xff]   ;;  %v692_v21 = vld [vmem:[#allocation2] ss:$8 sps:$4 sm:$0xff]   ;;  %v693_v22 = vld [vmem:[#allocation2 + $0xf4] ss:$8 sps:$4 sm:$0xff]  }
  0x15   :  { %344 = vmatpush1.bf16.msra.mxu1 %v674_v9  ;;  %v695_v23 = vld [vmem:[#allocation2 + $0xf0] ss:$8 sps:$4 sm:$0xff]   ;;  %v696_v24 = vld [vmem:[#allocation2 + $0xe4] ss:$8 sps:$4 sm:$0xff]   ;;  %v698_v25 = vld [vmem:[#allocation2 + $0xe0] ss:$8 sps:$4 sm:$0xff]  }
  0x16   :  { %586 = vmatmul.mubr.msk.bf16.vlgmr.msra.gmra.mxu0 %vm84_vm0, %v668_v8  ;;  %345 = vmatprep.subr.bf16.mxu1 %v675_v10  ;;  %v699_v26 = vld [vmem:[#allocation2 + $0xd4] ss:$8 sps:$4 sm:$0xff]   ;;  %v701_v27 = vld [vmem:[#allocation2 + $0xd0] ss:$8 sps:$4 sm:$0xff]   ;;  %v702_v28 = vld [vmem:[#allocation2 + $0xc4] ss:$8 sps:$4 sm:$0xff]  }
  0x17   :  { %v704_v29 = vld [vmem:[#allocation2 + $0xc0] ss:$8 sps:$4 sm:$0xff]   ;;  %v705_v30 = vld [vmem:[#allocation2 + $0xb4] ss:$8 sps:$4 sm:$0xff]   ;;  %v707_v31 = vld [vmem:[#allocation2 + $0xb0] ss:$8 sps:$4 sm:$0xff]  }
  0x18   :  { %v708_v32 = vld [vmem:[#allocation2 + $0xa4] ss:$8 sps:$4 sm:$0xff]   ;;  %v710_v33 = vld [vmem:[#allocation2 + $0xa0] ss:$8 sps:$4 sm:$0xff]   ;;  %v711_v34 = vld [vmem:[#allocation2 + $0x94] ss:$8 sps:$4 sm:$0xff]  }
  0x19   :  { %346 = vmatpush1.bf16.msra.mxu1 %v677_v11  ;;  %v713_v35 = vld [vmem:[#allocation2 + $0x90] ss:$8 sps:$4 sm:$0xff]   ;;  %v714_v36 = vld [vmem:[#allocation2 + $0x84] ss:$8 sps:$4 sm:$0xff]   ;;  %v716_v37 = vld [vmem:[#allocation2 + $0x80] ss:$8 sps:$4 sm:$0xff]  }
  0x1a   :  { %347 = vmatprep.subr.bf16.mxu1 %v678_v12  ;;  %v717_v38 = vld [vmem:[%s891_s5 + $0x78] sm:$0xff]   ;;  %v719_v40 = vld [vmem:[%s891_s5 + $0x70] sm:$0xff]   ;;  %v721_v42 = vld [vmem:[%s891_s5 + $0x68] sm:$0xff]   ;;  %v55_v50 = vsub.s32 1, %v50_v49  ;;  %v51_v51 = vsub.s32 0, %v50_v49  ;;  %vm573_vm2 = vcmask 64512  }
  0x1b   :  { %v718_v39 = vld [vmem:[%s891_s5 + $0x38] sm:$0xff]   ;;  %636 = vmatprep.subr.bf16.mxu0 %v717_v38  ;;  %v720_v41 = vld [vmem:[%s891_s5 + $0x30] sm:$0xff]   ;;  %v722_v43 = vld [vmem:[%s891_s5 + $0x28] sm:$0xff]  }
  0x1c   :  { %637 = vmatpush3.bf16.msra.mxu0 %v718_v39  ;;  %v723_v44 = vld [vmem:[%s891_s5 + $0x60] sm:$0xff]   ;;  %v725_v46 = vld [vmem:[%s891_s5 + $0x58] sm:$0xff]   ;;  %v727_v5 = vld [vmem:[%s891_s5 + $0x50] sm:$0xff]  }
  0x1d   :  { %348 = vmatpush1.bf16.msra.mxu1 %v680_v13  ;;  %638 = vmatprep.subr.bf16.mxu0 %v719_v40  ;;  %v724_v45 = vld [vmem:[%s891_s5 + $0x20] sm:$0xff]   ;;  %v726_v47 = vld [vmem:[%s891_s5 + $0x18] sm:$0xff]   ;;  %v728_v6 = vld [vmem:[%s891_s5 + $0x10] sm:$0xff]  }
  0x1e   :  { %349 = vmatprep.subr.bf16.mxu1 %v681_v14  ;;  %v47_v52 = vld [vmem:[%s888_s2] sm:$0x3]  ;;  %v729_v7 = vld [vmem:[%s891_s5 + $0x48] sm:$0xff]  }
  0x1f   :  { %v56_v54 = vrot.slane %v47_v52, %v55_v50  ;;  %v52_v55 = vrot.slane %v47_v52, %v51_v51  ;;  %v730_v8 = vld [vmem:[%s891_s5 + $0x8] sm:$0xff]   ;;  %v731_v9 = vld [vmem:[%s891_s5 + $0x40] sm:$0xff]  }
  0x20   :  { %639 = vmatpush3.bf16.msra.mxu0 %v720_v41  ;;  %v732_v10 = vld [vmem:[%s891_s5] sm:$0xff]  }
  0x21   :  { %350 = vmatpush1.bf16.msra.mxu1 %v683_v15  ;;  %640 = vmatprep.subr.bf16.mxu0 %v721_v42  ;;  %v169_v11 = vld [vmem:[%s890_s4] sm:$0x3] }
  0x22   :  { %351 = vmatprep.subr.bf16.mxu1 %v684_v16  ;;  %v178_v13 = vrot.slane %v169_v11, %v55_v50  ;;  %v174_v14 = vrot.slane %v169_v11, %v51_v51 }
  0x24   :  { %641 = vmatpush3.bf16.msra.mxu0 %v722_v43 }
  0x25   :  { %352 = vmatpush1.bf16.msra.mxu1 %v686_v17  ;;  %642 = vmatprep.subr.bf16.mxu0 %v723_v44 }
  0x26   :  { %353 = vmatprep.subr.bf16.mxu1 %v687_v18 }
  0x28   :  { %643 = vmatpush3.bf16.msra.mxu0 %v724_v45 }
  0x29   :  { %354 = vmatpush1.bf16.msra.mxu1 %v689_v19  ;;  %644 = vmatprep.subr.bf16.mxu0 %v725_v46 }
  0x2a   :  { %355 = vmatprep.subr.bf16.mxu1 %v690_v20 }
  0x2c   :  { %645 = vmatpush3.bf16.msra.mxu0 %v726_v47 }
  0x2d   :  { %356 = vmatpush1.bf16.msra.mxu1 %v692_v21  ;;  %646 = vmatprep.subr.bf16.mxu0 %v727_v5 }
  0x2e   :  { %357 = vmatprep.subr.bf16.mxu1 %v693_v22 }
  0x30   :  { %647 = vmatpush3.bf16.msra.mxu0 %v728_v6 }
  0x31   :  { %358 = vmatpush2.bf16.msra.mxu1 %v695_v23  ;;  %648 = vmatprep.subr.bf16.mxu0 %v729_v7 }
  0x32   :  { %359 = vmatprep.subr.bf16.mxu1 %v696_v24 }
  0x34   :  { %649 = vmatpush3.bf16.msra.mxu0 %v730_v8 }
  0x35   :  { %360 = vmatpush2.bf16.msra.mxu1 %v698_v25  ;;  %650 = vmatprep.subr.bf16.mxu0 %v731_v9 }
  0x36   :  { %361 = vmatprep.subr.bf16.mxu1 %v699_v26 }
  0x38   :  { %651 = vmatpush3.bf16.msra.mxu0 %v732_v10 }
  0x39   :  { %362 = vmatpush2.bf16.msra.mxu1 %v701_v27 }
  0x3a   :  { %363 = vmatprep.subr.bf16.mxu1 %v702_v28 }
  0x3d   :  { %364 = vmatpush2.bf16.msra.mxu1 %v704_v29  ;;  %v619_v29 = vld [vmem:[%s892_s6] ss:$0 sm:$0xff] }
  0x3e   :  { %365 = vmatprep.subr.bf16.mxu1 %v705_v30 }
  0x41   :  { %366 = vmatpush2.bf16.msra.mxu1 %v707_v31 }
  0x42   :  { %367 = vmatprep.subr.bf16.mxu1 %v708_v32 }
  0x45   :  { %368 = vmatpush2.bf16.msra.mxu1 %v710_v33 }
  0x46   :  { %369 = vmatprep.subr.bf16.mxu1 %v711_v34 }
  0x49   :  { %370 = vmatpush2.bf16.msra.mxu1 %v713_v35 }
  0x4a   :  { %371 = vmatprep.subr.bf16.mxu1 %v714_v36 }
  0x4d   :  { %372 = vmatpush2.bf16.msra.mxu1 %v716_v37  ;;  %v567_v37 = vand.u32 127, %v49_v48 }
  0x4f   :  { %vm568_vm1 = vcmp.lt.s32.totalorder %v567_v37, 4 }
  0xd6   :  { %v122_v53 = vpop.f32.mrf.mxu0 }
  0xd7   :  { %v123_v60 = vadd.f32 %v122_v53, %v52_v55 }
  0xd8   :  { %v124_v56 = vpop.f32.mrf.mxu0 }
  0xd9   :  { %v125_v58 = vadd.f32 %v124_v56, %v56_v54  ;;  %v131_v2 = vmax.f32 %v123_v60, 0.0 }
  0xda   :  { %v126_v57 = vpop.f32.mrf.mxu0 }
  0xdb   :  { %v127_v59 = vadd.f32 %v126_v57, %v52_v55  ;;  %v132_v0 = vmax.f32 %v125_v58, 0.0 }
  0xdc   :  { %v128_v61 = vpop.f32.mrf.mxu0 }
  0xdd   :  { %v129_v62 = vadd.f32 %v128_v61, %v56_v54  ;;  %v133_v63 = vmax.f32 %v127_v59, 0.0 }
  0xdf   :  { %v134_v1 = vmax.f32 %v129_v62, 0.0  ;;  %v135_v4 = vpack.c.bf16 %v133_v63, %v131_v2 }
  0xe1   :  { %v136_v3 = vpack.c.bf16 %v134_v1, %v132_v0 }
  0xe3   :  { %373 = vmatprep.mubr.bf16.mxu1 %v136_v3 }
  0xe4   :  { %374 = vmatmul.mubr.bf16.vlgmr.msra.gmra.mxu1 %v135_v4 }
 0x1a4   :  { %v375_v12 = vpop.f32.mrf.mxu1 }
 0x1a5   :  { %v376_v19 = vadd.f32 %v375_v12, %v174_v14 }
 0x1a6   :  { %v377_v15 = vpop.f32.mrf.mxu1 }
 0x1a7   :  { %v378_v17 = vadd.f32 %v377_v15, %v178_v13  ;;  %v384_v25 = vmax.f32 %v376_v19, 0.0 }
 0x1a8   :  { %v379_v16 = vpop.f32.mrf.mxu1 }
 0x1a9   :  { %v380_v18 = vadd.f32 %v379_v16, %v174_v14  ;;  %v385_v23 = vmax.f32 %v378_v17, 0.0 }
 0x1aa   :  { %v381_v20 = vpop.f32.mrf.mxu1 }
 0x1ab   :  { %v382_v21 = vadd.f32 %v381_v20, %v178_v13  ;;  %v386_v22 = vmax.f32 %v380_v18, 0.0 }
 0x1ad   :  { %v387_v24 = vmax.f32 %v382_v21, 0.0  ;;  %v388_v27 = vpack.c.bf16 %v386_v22, %v384_v25 }
 0x1af   :  { %v389_v26 = vpack.c.bf16 %v387_v24, %v385_v23 }
 0x1b1   :  { %557 = vmatprep.mubr.bf16.mxu0 %v389_v26 }
 0x1b2   :  { %558 = vmatmul.mubr.bf16.vlgmr.msra.gmra.mxu0 %v388_v27 }
 0x272   :  { %v652_v28 = vpop.f32.mrf.mxu0 }
 0x274   :  { %v653_v30 = vpop.f32.mrf.mxu0 }
 0x275   :  { %v654_v31 = vadd.f32 %v653_v30, %v652_v28 }
 0x276   :  { %v655_v32 = vpop.f32.mrf.mxu0 }
 0x277   :  { %v560_v33 = vadd.f32 %v654_v31, %v619_v29 }
 0x278   :  { %v656_v34 = vpop.f32.mrf.mxu0 }
 0x279   :  { %733 = vtanh.f32 %v560_v33  ;;  %v657_v35 = vadd.f32 %v656_v34, %v655_v32 }
 0x27b   :  { %v563_v36 = vadd.f32 %v657_v35, %v619_v29 }
 0x27d   :  { %735 = vtanh.f32 %v563_v36 }
 0x286   :  { %v734_v38 = vpop.eup %733 }
 0x287   :  { %v571_v39 = vsel %vm568_vm1, %v734_v38, %v560_v33 }
 0x288   :  { %574 = vst.msk [vmem:[%s893_s7] sm:$0xff] %vm573_vm2, %v571_v39 }
 0x28a   :  { %v736_v40 = vpop.eup %735 }
 0x28b   :  { %v572_v41 = vsel %vm568_vm1, %v736_v40, %v563_v36 }
 0x28c   :  { %575 = vst.msk [vmem:[%s893_s7 + $0x8] sm:$0xff] %vm573_vm2, %v572_v41 }
 0x28d   :  { %580 = vsyncpa [#allocation3], 1 }

</bundles_post_ra>
